<compile_context>
chip_gen: v7x
topology: tpu7x:2x2x1
jax: 0.10.0
libtpu: 0.0.40
codegen_flags: <defaults>
</compile_context>

<pallas_src>
import functools

import jax
import jax.numpy as jnp
from jax import lax
from jax.experimental import pallas as pl
from jax.experimental.pallas import tpu as pltpu


def _round_up(x, m):
    return ((x + m - 1) // m) * m


def _gem_sum_kernel(x_ref, o_ref, *scratch, p, p_is_int, eps, S, s_tile,
                    mask_lanes, compute_dtype, multi_k):
    """Per-row sum of clamp(x, eps)**p over the spatial (lane) axis."""
    x = x_ref[...]
    if x.dtype != compute_dtype:
        x = x.astype(compute_dtype)

    x = jnp.maximum(x, eps)                       # clamp(min=eps), native dtype
    if p_is_int:
        xp = lax.integer_pow(x, int(p))           # VALU multiplies (p=3 -> x*x*x)
    else:
        xp = x ** p                               # general pow (EUP exp/log)

    if mask_lanes:
        # Ragged last spatial block: exclude out-of-bounds lanes from the sum.
        k = pl.program_id(1)
        lane = lax.broadcasted_iota(jnp.int32, xp.shape, 1) + k * s_tile
        xp = jnp.where(lane < S, xp, jnp.zeros_like(xp))

    psum = jnp.sum(xp, axis=-1, keepdims=True, dtype=jnp.float32)

    if not multi_k:
        # Common case: the whole spatial extent fits in one block; no scratch.
        o_ref[...] = psum
    else:
        (acc_ref,) = scratch
        k = pl.program_id(1)

        @pl.when(k == 0)
        def _():
            acc_ref[...] = jnp.zeros_like(acc_ref)

        acc_ref[...] += psum

        @pl.when(k == pl.num_programs(1) - 1)
        def _():
            o_ref[...] = acc_ref[...]


def _plan(R, S, in_itemsize):
    """Pick (row_tile, s_tile, vmem_limit) from a padding-aware VMEM budget."""
    # Sublane packing: f32 -> 8 rows, bf16 -> 16, int8/fp8 -> 32.
    sub = {4: 8, 2: 16, 1: 32}.get(in_itemsize, 8)

    # Generation-aware VMEM limit (review #3/#4); unknown -> conservative v7x.
    try:
        cap = int(pltpu.get_tpu_info().vmem_capacity_bytes)
    except Exception:
        cap = 64 * 1024 * 1024
    vmem_limit = 48 * 2**20 if cap <= 64 * 2**20 else 64 * 2**20
    usable = vmem_limit - 2 * 2**20          # headroom for Mosaic internals

    s_pad = _round_up(S, 128)                # lane padding of the VMEM tile
    out_bytes_per_row = 2 * 128 * 4          # (row_tile, 1) f32 out block, x2 buffers

    # Common case: full spatial extent in one block per row.
    per_row = 2 * s_pad * in_itemsize + out_bytes_per_row
    max_rows = usable // per_row
    if max_rows >= sub:
        row_tile = min((max_rows // sub) * sub, _round_up(R, sub))
        if row_tile >= R and R > sub:
            # Keep >= 2 row blocks so the "parallel" axis can use both v7x TCs.
            row_tile = _round_up(-(-R // 2), sub)
        return row_tile, S, vmem_limit

    # Very large H*W: tile the spatial axis, small row tile + f32 accumulator.
    row_tile = sub
    acc_bytes = row_tile * 128 * 4
    rem = usable - row_tile * out_bytes_per_row - acc_bytes
    s_tile = max(128, (rem // (2 * row_tile * in_itemsize)) // 128 * 128)
    s_tile = min(s_tile, _round_up(S, 128))
    return row_tile, s_tile, vmem_limit


def gem_pool(x, p=3.0, eps=1e-6, *, _debug_blocks=None):
    """GeM pooling. x: (N, C, H, W) -> (N, C, 1, 1)."""
    N, C, H, W = x.shape
    R, S = N * C, H * W
    x2 = x.reshape(R, S)                     # no HBM padding pass
    in_itemsize = jnp.dtype(x.dtype).itemsize

    if _debug_blocks is None:
        row_tile, s_tile, vmem_limit = _plan(R, S, in_itemsize)
    else:
        # Testing hook: force small blocks so the spatial-tiled accumulator
        # path can be exercised with small shapes (s_tile must be 128*k).
        row_tile, s_tile = _debug_blocks
        vmem_limit = 48 * 2**20
    if s_tile >= S:
        s_tile = S

    grid = (pl.cdiv(R, row_tile), pl.cdiv(S, s_tile))
    multi_k = grid[1] > 1

    p = float(p)
    p_is_int = p.is_integer()
    # Review #9: stay in bf16 for clamp/pow on bf16 inputs; accumulate in f32.
    compute_dtype = jnp.bfloat16 if x.dtype == jnp.bfloat16 else jnp.float32

    kernel = functools.partial(
        _gem_sum_kernel, p=p, p_is_int=p_is_int, eps=float(eps), S=S,
        s_tile=s_tile, mask_lanes=(S % s_tile != 0),
        compute_dtype=compute_dtype, multi_k=multi_k)

    scratch = [pltpu.VMEM((row_tile, 1), jnp.float32)] if multi_k else []

    cost = pl.CostEstimate(
        flops=4 * R * S,
        transcendentals=0 if p_is_int else 2 * R * S,
        bytes_accessed=R * S * in_itemsize + R * 4)

    sums = pl.pallas_call(
        kernel,
        out_shape=jax.ShapeDtypeStruct((R, 1), jnp.float32),
        grid_spec=pltpu.PrefetchScalarGridSpec(
            num_scalar_prefetch=0,
            grid=grid,
            in_specs=[pl.BlockSpec((row_tile, s_tile), lambda i, k: (i, k))],
            out_specs=pl.BlockSpec((row_tile, 1), lambda i, k: (i, 0)),
            scratch_shapes=scratch),
        compiler_params=pltpu.CompilerParams(
            dimension_semantics=("parallel", "arbitrary"),
            vmem_limit_bytes=vmem_limit),
        cost_estimate=cost,
    )(x2)

    # Lane-dense epilogue over just R values: mean over H*W and the 1/p root.
    # Keeping these out of the kernel avoids EUP exp/log on a (row_tile, 1)
    # column layout (1 useful lane per vreg), which would otherwise bind.
    y = (sums * (1.0 / S)) ** (1.0 / p)
    return y.astype(x.dtype).reshape(N, C, 1, 1)


def gem_ref(x, p=3.0, eps=1e-6):
    """Pure-JAX f32 reference mirroring the PyTorch forward."""
    xf = x.astype(jnp.float32)
    xp = jnp.clip(xf, eps, None) ** p
    m = jnp.mean(xp, axis=(2, 3), keepdims=True)
    return m ** (1.0 / p)


if __name__ == "__main__":
    keys = jax.random.split(jax.random.PRNGKey(0), 5)

    # 1) Aligned case (S = 256 is lane-dense).
    x = jax.random.uniform(keys[0], (2, 4, 16, 16), jnp.float32, -1.0, 2.0)
    y = jax.block_until_ready(gem_pool(x, p=3.0, eps=1e-6))
    assert y.shape == (2, 4, 1, 1)
    assert jnp.allclose(y, gem_ref(x), atol=1e-5, rtol=1e-5), (
        f"max abs err {jnp.max(jnp.abs(y - gem_ref(x)))}")

    # 2) Ragged rows (R = 15) and non-128 spatial (S = 63); also exercises the
    #    grid[0] >= 2 split and Pallas-bounded edge blocks.
    x = jax.random.uniform(keys[1], (3, 5, 7, 9), jnp.float32, -1.0, 2.0)
    y = jax.block_until_ready(gem_pool(x, p=3.0, eps=1e-6))
    assert jnp.allclose(y, gem_ref(x), atol=1e-5, rtol=1e-5), (
        f"max abs err {jnp.max(jnp.abs(y - gem_ref(x)))}")

    # 3) Force the spatial-tiled accumulator path (+ ragged last spatial block)
    #    with small shapes via the testing hook: S = 304, s_tile = 128.
    x = jax.random.uniform(keys[2], (2, 4, 16, 19), jnp.float32, -1.0, 2.0)
    y = jax.block_until_ready(gem_pool(x, p=3.0, eps=1e-6,
                                       _debug_blocks=(8, 128)))
    assert jnp.allclose(y, gem_ref(x), atol=1e-5, rtol=1e-5), (
        f"max abs err {jnp.max(jnp.abs(y - gem_ref(x)))}")

    # 4) bf16 input: clamp/pow stay in bf16, accumulation in f32.
    x = jax.random.uniform(keys[3], (2, 8, 7, 7), jnp.float32, 0.0, 2.0
                           ).astype(jnp.bfloat16)
    y = jax.block_until_ready(gem_pool(x, p=3.0, eps=1e-6))
    assert y.dtype == jnp.bfloat16
    assert jnp.allclose(y.astype(jnp.float32), gem_ref(x),
                        atol=2e-2, rtol=2e-2)

    # 5) Non-integer p exercises the general pow path.
    x = jax.random.uniform(keys[4], (2, 4, 8, 8), jnp.float32, -1.0, 2.0)
    y = jax.block_until_ready(gem_pool(x, p=2.5, eps=1e-6))
    assert jnp.allclose(y, gem_ref(x, p=2.5), atol=1e-4, rtol=1e-4)

    print("KERNEL_OK")
</pallas_src>

<mosaic_0001>
module attributes {stable_mosaic.version = 11 : i64} {
  func.func @_gem_sum_kernel(%arg0: i32, %arg1: i32, %arg2: memref<8x256xf32, #tpu.memory_space<vmem>>, %arg3: memref<8x1xf32, #tpu.memory_space<vmem>>) attributes {dimension_semantics = [#tpu.dimension_semantics<parallel>, #tpu.dimension_semantics<arbitrary>], iteration_bounds = array<i64: 1, 1>, scalar_prefetch = 0 : i64, scratch_operands = 0 : i64, tpu.core_type = #tpu.core_type<tc>, window_params = [{transform_indices = @transform_0, window_bounds = array<i64: 8, 256>}, {transform_indices = @transform_1, window_bounds = array<i64: 8, 1>}]} {
    %c0 = arith.constant 0 : index
    %c0_0 = arith.constant 0 : index
    %0 = vector.load %arg2[%c0, %c0_0] : memref<8x256xf32, #tpu.memory_space<vmem>>, vector<8x256xf32>
    %cst = arith.constant 9.99999997E-7 : f32
    %1 = vector.broadcast %cst : f32 to vector<8x256xf32>
    %2 = arith.maximumf %0, %1 : vector<8x256xf32>
    %3 = arith.mulf %2, %2 : vector<8x256xf32>
    %4 = arith.mulf %2, %3 : vector<8x256xf32>
    %cst_1 = arith.constant dense<0.000000e+00> : vector<8xf32>
    %5 = vector.multi_reduction <add>, %4, %cst_1 [1] : vector<8x256xf32> to vector<8xf32>
    %6 = vector.shape_cast %5 : vector<8xf32> to vector<8x1xf32>
    %c0_2 = arith.constant 0 : index
    %c0_3 = arith.constant 0 : index
    %7 = vector.load %arg3[%c0_2, %c0_3] : memref<8x1xf32, #tpu.memory_space<vmem>>, vector<8x1xf32>
    tpu.vector_store %arg3[%c0_2, %c0_3], %6 {strides = array<i32>} : memref<8x1xf32, #tpu.memory_space<vmem>>, vector<8x1xf32>,
    return
  }
  func.func @transform_0(%arg0: i32, %arg1: i32) -> (i32, i32) {
    %c0_i32 = arith.constant 0 : i32
    return %arg0, %arg1 : i32, i32
  }
  func.func @transform_1(%arg0: i32, %arg1: i32) -> (i32, i32) {
    %c0_i32 = arith.constant 0 : i32
    %c0_i32_0 = arith.constant 0 : i32
    return %arg0, %c0_i32 : i32, i32
  }
}

</mosaic_0001>

<bundles_post_ra>
// kernel: tpu_custom_call.1
= control target key start
LH: loop header
LB: loop body
LE: loop exit
PB: predicated region body
PF: predicated region fallthrough
CT: control target
= control target key end

     0   :  { %6 = vsyncpa [#allocation3], 0  ;;  %s63_s6 = smov [#allocation2]   ;;  %s89_s0 = inlined_call_operand.hbm [shape: f32[8,256], index: 0, kind: input, shape index: {}]   ;;  %s90_s1 = inlined_call_operand.vmem [shape: f32[8,1], index: 1, kind: output, shape index: {}]  }
   0x1   :  { %s13_s7 = sshll.u32 %s63_s6, 4  ;;  %s39_s10 = scalar_lea.hbm %s89_s0, 256  ;;  %s14_s7 = int_to_ptr.vmem [resolvable:$true] %s13_s7 }
   0x2   :  { %p40_p0 = scmp.ne.s32.totalorder %s89_s0, %s39_s10  ;;  %p43_p1 = scmp.lt.u32.totalorder %s39_s10, %s89_s0 }
   0x4   :  { %p45_p2 = pnand %p43_p1, %p40_p0 }
   0x6   :  { %48 = shalt.err (!%p45_p2)
}
   0x7   :  { %s49_s15 = scalar_lea.vmem %s14_s7, 256  ;;  %p54_p4 = scmp.lt.s32.totalorder %s14_s7, %s14_s7 }
   0x8   :  { %p50_p3 = scmp.ne.s32.totalorder %s14_s7, %s49_s15  ;;  %p55_p5 = scmp.lt.s32.totalorder %s49_s15, %s49_s15 }
   0xa   :  { %p56_p6 = por %p55_p5, %p54_p4 }
   0xc   :  { %p57_p7 = pnand %p56_p6, %p50_p3 }
   0xe   :  { %60 = shalt.err (!%p57_p7)
}
   0xf   :  { %16 = dma.hbm_to_vmem [thread:$0]  %s89_s0, 256, %s14_s7, [#allocation3]  }
  0x10   :  { %61 = dma.done.wait [#allocation3], 256  }
  0x11   :  { %62 = vsyncadd [#allocation3], 4294967040  ;;  %v20_v0 = vld [vmem:[#allocation2] sm:$0xff]  ;;  %v21_v1 = vld [vmem:[#allocation2 + $0x8] sm:$0xff]  ;;  %vm31_vm0 = vcmask 7168  }
  0x12   :  { %v22_v2 = vmax.f32 %v20_v0, 1e-06  ;;  %v23_v3 = vmax.f32 %v21_v1, 1e-06 }
  0x14   :  { %v24_v4 = vmul.f32 %v22_v2, %v22_v2  ;;  %v25_v5 = vmul.f32 %v23_v3, %v23_v3 }
  0x16   :  { %v26_v6 = vmul.f32 %v24_v4, %v22_v2  ;;  %v27_v7 = vmul.f32 %v25_v5, %v23_v3 }
  0x18   :  { %v28_v8 = vadd.f32 %v27_v7, %v26_v6 }
  0x1a   :  { %29 = vadd.xlane.f32.xlu0 %v28_v8 }
  0xa7   :  { %v30_v9 = vpop.xlane.xlu0 %29 }
  0xa8   :  { %32 = vst.msk [vmem:[%s90_s1] sm:$0xff] %vm31_vm0, %v30_v9 }
  0xa9   :  { %37 = vsyncpa [#allocation3], 1 }

</bundles_post_ra>
